<compile_context>
chip_gen: v6e
topology: v6e:2x2x1
jax: 0.10.0
libtpu: 0.0.40
codegen_flags: <defaults>
</compile_context>

<pallas_src>
import jax
import jax.numpy as jnp
from jax.experimental import pallas as pl
from jax.experimental.pallas import tpu as pltpu


def _round_up(n, m):
    return ((n + m - 1) // m) * m


def mlp_kernel(x_ref, w1_ref, b1_ref, w2_ref, w3_ref, w4_ref, b4_ref, o_ref):
    # hidden1 = relu(x @ W1 + b1)      (nn.Linear with bias)
    h1 = jnp.dot(x_ref[...], w1_ref[...], preferred_element_type=jnp.float32)
    h1 = jnp.maximum(h1 + b1_ref[...], 0.0).astype(jnp.bfloat16)
    # hidden2 = relu(hidden1 @ W2)     (raw matmul, no bias)
    h2 = jnp.dot(h1, w2_ref[...], preferred_element_type=jnp.float32)
    h2 = jnp.maximum(h2, 0.0).astype(jnp.bfloat16)
    # hidden3 = relu(hidden2 @ W3)     (raw matmul, no bias)
    h3 = jnp.dot(h2, w3_ref[...], preferred_element_type=jnp.float32)
    h3 = jnp.maximum(h3, 0.0).astype(jnp.bfloat16)
    # output = hidden3 @ W4 + b4       (nn.Linear with bias)
    out = jnp.dot(h3, w4_ref[...], preferred_element_type=jnp.float32)
    o_ref[...] = (out + b4_ref[...]).astype(o_ref.dtype)


def three_hidden_mlp(x, params, *, tb=512):
    """x: (B, C, H, W) or (B, input_size). Returns (B, output_size) float32.

    tb: batch tile. Default 512 fits comfortably in v5e's 16 MiB scoped VMEM;
    can be raised to 1024-4096 on v6e/v7x (weights resident ~0.65 MB bf16,
    x tile = tb*784*2 B, out tile = tb*128*4 B, each double-buffered).
    """
    w1, b1, w2, w3, w4, b4 = params
    B = x.shape[0]
    x2d = x.reshape(B, -1).astype(jnp.float32)       # x.view(x.size(0), -1)
    D = x2d.shape[1]                                 # 784
    H1, H2 = w2.shape                                # 29, 147
    H3, OUT = w4.shape                               # 400, 10

    # Lane-aligned (multiple-of-128) padded feature dims.
    H1p, H2p, H3p, OUTp = (_round_up(d, 128) for d in (H1, H2, H3, OUT))

    # Batch tile: multiple of 8 sublanes; pad B up to a multiple of the tile.
    tb = max(8, min(tb, _round_up(B, 8)))
    Bp = _round_up(B, tb)

    def pad2(a, rows, cols):
        return jnp.pad(a, ((0, rows - a.shape[0]), (0, cols - a.shape[1])))

    # bf16 matmul operands, zero padding (exactly neutral through matmul/ReLU).
    xb = pad2(x2d, Bp, D).astype(jnp.bfloat16)                         # (Bp, 784)
    w1p = pad2(w1.astype(jnp.float32), D, H1p).astype(jnp.bfloat16)    # (784, 128)
    w2p = pad2(w2.astype(jnp.float32), H1p, H2p).astype(jnp.bfloat16)  # (128, 256)
    w3p = pad2(w3.astype(jnp.float32), H2p, H3p).astype(jnp.bfloat16)  # (256, 512)
    w4p = pad2(w4.astype(jnp.float32), H3p, OUTp).astype(jnp.bfloat16) # (512, 128)
    b1p = pad2(b1.reshape(1, -1).astype(jnp.float32), 1, H1p)          # f32 bias
    b4p = pad2(b4.reshape(1, -1).astype(jnp.float32), 1, OUTp)         # f32 bias

    grid = (Bp // tb,)
    const = lambda i: (0, 0)   # weights/biases: same block every step -> VMEM-resident

    weight_bytes = sum(int(a.size) * a.dtype.itemsize
                       for a in (w1p, w2p, w3p, w4p, b1p, b4p))
    cost = pl.CostEstimate(
        flops=2 * Bp * (D * H1p + H1p * H2p + H2p * H3p + H3p * OUTp),
        bytes_accessed=int(xb.size) * 2 + weight_bytes + Bp * OUTp * 4,
        transcendentals=0,
    )

    out_padded = pl.pallas_call(
        mlp_kernel,
        out_shape=jax.ShapeDtypeStruct((Bp, OUTp), jnp.float32),
        grid=grid,
        in_specs=[
            pl.BlockSpec((tb, D), lambda i: (i, 0)),   # x tile, double-buffered
            pl.BlockSpec((D, H1p), const),
            pl.BlockSpec((1, H1p), const),
            pl.BlockSpec((H1p, H2p), const),
            pl.BlockSpec((H2p, H3p), const),
            pl.BlockSpec((H3p, OUTp), const),
            pl.BlockSpec((1, OUTp), const),
        ],
        out_specs=pl.BlockSpec((tb, OUTp), lambda i: (i, 0)),  # lane-dense store
        compiler_params=pltpu.CompilerParams(
            dimension_semantics=("parallel",),
        ),
        cost_estimate=cost,
    )(xb, w1p, b1p, w2p, w3p, w4p, b4p)

    # Slice away batch + lane padding.
    return out_padded[:B, :OUT]


def init_params(key, input_size=784, h1=29, h2=147, h3=400, out=10):
    """Deterministic synthetic init matching the PyTorch module's shapes."""
    k = jax.random.split(key, 6)
    # nn.Linear(input_size, h1): uniform(-1/sqrt(in), 1/sqrt(in)); weights pre-transposed to (in, out)
    bound1 = 1.0 / jnp.sqrt(input_size)
    w1 = jax.random.uniform(k[0], (input_size, h1), jnp.float32, -bound1, bound1)
    b1 = jax.random.uniform(k[1], (1, h1), jnp.float32, -bound1, bound1)
    # hidden1_to_hidden2, hidden2_to_hidden3: torch.randn((in, out))
    w2 = jax.random.normal(k[2], (h1, h2), jnp.float32)
    w3 = jax.random.normal(k[3], (h2, h3), jnp.float32)
    # nn.Linear(h3, out)
    bound4 = 1.0 / jnp.sqrt(h3)
    w4 = jax.random.uniform(k[4], (h3, out), jnp.float32, -bound4, bound4)
    b4 = jax.random.uniform(k[5], (1, out), jnp.float32, -bound4, bound4)
    return (w1, b1, w2, w3, w4, b4)


def reference_forward_f32(x, params):
    """Pure-JAX f32 reference of the PyTorch forward."""
    w1, b1, w2, w3, w4, b4 = params
    h = x.reshape(x.shape[0], -1).astype(jnp.float32)
    h = jax.nn.relu(h @ w1 + b1)
    h = jax.nn.relu(h @ w2)
    h = jax.nn.relu(h @ w3)
    return h @ w4 + b4


def reference_forward_bf16(x, params):
    """Pure-JAX reference with the same bf16-inputs / f32-accumulation recipe as the kernel."""
    w1, b1, w2, w3, w4, b4 = params
    f32, bf16 = jnp.float32, jnp.bfloat16
    h = x.reshape(x.shape[0], -1).astype(bf16)
    h = jax.nn.relu(jnp.dot(h, w1.astype(bf16), preferred_element_type=f32)
                    + b1.astype(f32)).astype(bf16)
    h = jax.nn.relu(jnp.dot(h, w2.astype(bf16), preferred_element_type=f32)).astype(bf16)
    h = jax.nn.relu(jnp.dot(h, w3.astype(bf16), preferred_element_type=f32)).astype(bf16)
    return jnp.dot(h, w4.astype(bf16), preferred_element_type=f32) + b4.astype(f32)


if __name__ == "__main__":
    key = jax.random.PRNGKey(0)
    kx, kp = jax.random.split(key)
    # MNIST-style input: batch=2, 1x28x28 -> flattened to input_size=784
    x = jax.random.normal(kx, (2, 1, 28, 28), jnp.float32)
    params = init_params(kp)

    out = three_hidden_mlp(x, params)
    out = jax.block_until_ready(out)
    assert out.shape == (2, 10), out.shape

    # Tight check vs a reference using the same bf16/f32-accum recipe.
    ref_bf16 = reference_forward_bf16(x, params)
    assert jnp.allclose(out, ref_bf16, atol=5e-2, rtol=5e-2), "mismatch vs bf16-matched reference"

    # Loose sanity check vs the full-f32 module semantics (bf16 matmul inputs
    # introduce sub-percent relative error at these magnitudes).
    ref_f32 = reference_forward_f32(x, params)
    rel_err = jnp.max(jnp.abs(out - ref_f32)) / (jnp.max(jnp.abs(ref_f32)) + 1e-6)
    assert rel_err < 1e-1, float(rel_err)

    print("KERNEL_OK")
</pallas_src>

<mosaic_0001>
module attributes {stable_mosaic.version = 11 : i64} {
  func.func @mlp_kernel(%arg0: i32, %arg1: memref<8x784xbf16, #tpu.memory_space<vmem>>, %arg2: memref<784x128xbf16, #tpu.memory_space<vmem>>, %arg3: memref<1x128xf32, #tpu.memory_space<vmem>>, %arg4: memref<128x256xbf16, #tpu.memory_space<vmem>>, %arg5: memref<256x512xbf16, #tpu.memory_space<vmem>>, %arg6: memref<512x128xbf16, #tpu.memory_space<vmem>>, %arg7: memref<1x128xf32, #tpu.memory_space<vmem>>, %arg8: memref<8x128xf32, #tpu.memory_space<vmem>>) attributes {dimension_semantics = [#tpu.dimension_semantics<parallel>], iteration_bounds = array<i64: 1>, scalar_prefetch = 0 : i64, scratch_operands = 0 : i64, tpu.core_type = #tpu.core_type<tc>, window_params = [{transform_indices = @transform_0, window_bounds = array<i64: 8, 784>}, {pipeline_mode = #tpu.pipeline_mode<synchronous>, transform_indices = @transform_1, window_bounds = array<i64: 784, 128>}, {pipeline_mode = #tpu.pipeline_mode<synchronous>, transform_indices = @transform_2, window_bounds = array<i64: 1, 128>}, {pipeline_mode = #tpu.pipeline_mode<synchronous>, transform_indices = @transform_3, window_bounds = array<i64: 128, 256>}, {pipeline_mode = #tpu.pipeline_mode<synchronous>, transform_indices = @transform_4, window_bounds = array<i64: 256, 512>}, {pipeline_mode = #tpu.pipeline_mode<synchronous>, transform_indices = @transform_5, window_bounds = array<i64: 512, 128>}, {pipeline_mode = #tpu.pipeline_mode<synchronous>, transform_indices = @transform_6, window_bounds = array<i64: 1, 128>}, {transform_indices = @transform_7, window_bounds = array<i64: 8, 128>}]} {
    %c0 = arith.constant 0 : index
    %c0_0 = arith.constant 0 : index
    %0 = vector.load %arg1[%c0, %c0_0] : memref<8x784xbf16, #tpu.memory_space<vmem>>, vector<8x784xbf16>
    %c0_1 = arith.constant 0 : index
    %c0_2 = arith.constant 0 : index
    %1 = vector.load %arg2[%c0_1, %c0_2] : memref<784x128xbf16, #tpu.memory_space<vmem>>, vector<784x128xbf16>
    %cst = arith.constant dense<0.000000e+00> : vector<8x128xf32>
    %2 = tpu.matmul %0, %1, %cst {dimension_numbers = #tpu.dot_dimension_numbers<[1], [0], [0], [1], [0, 0, 1, 1], [], []>} : vector<8x784xbf16>, vector<784x128xbf16>, vector<8x128xf32> -> vector<8x128xf32>
    %c0_3 = arith.constant 0 : index
    %c0_4 = arith.constant 0 : index
    %3 = vector.load %arg3[%c0_3, %c0_4] : memref<1x128xf32, #tpu.memory_space<vmem>>, vector<1x128xf32>
    %4 = vector.broadcast %3 : vector<1x128xf32> to vector<8x128xf32>
    %5 = arith.addf %2, %4 : vector<8x128xf32>
    %cst_5 = arith.constant 0.000000e+00 : f32
    %6 = vector.broadcast %cst_5 : f32 to vector<8x128xf32>
    %7 = arith.maximumf %5, %6 : vector<8x128xf32>
    %8 = arith.truncf %7 : vector<8x128xf32> to vector<8x128xbf16>
    %c0_6 = arith.constant 0 : index
    %c0_7 = arith.constant 0 : index
    %9 = vector.load %arg4[%c0_6, %c0_7] : memref<128x256xbf16, #tpu.memory_space<vmem>>, vector<128x256xbf16>
    %cst_8 = arith.constant dense<0.000000e+00> : vector<8x256xf32>
    %10 = tpu.matmul %8, %9, %cst_8 {dimension_numbers = #tpu.dot_dimension_numbers<[1], [0], [0], [1], [0, 0, 1, 1], [], []>} : vector<8x128xbf16>, vector<128x256xbf16>, vector<8x256xf32> -> vector<8x256xf32>
    %cst_9 = arith.constant 0.000000e+00 : f32
    %11 = vector.broadcast %cst_9 : f32 to vector<8x256xf32>
    %12 = arith.maximumf %10, %11 : vector<8x256xf32>
    %13 = arith.truncf %12 : vector<8x256xf32> to vector<8x256xbf16>
    %c0_10 = arith.constant 0 : index
    %c0_11 = arith.constant 0 : index
    %14 = vector.load %arg5[%c0_10, %c0_11] : memref<256x512xbf16, #tpu.memory_space<vmem>>, vector<256x512xbf16>
    %cst_12 = arith.constant dense<0.000000e+00> : vector<8x512xf32>
    %15 = tpu.matmul %13, %14, %cst_12 {dimension_numbers = #tpu.dot_dimension_numbers<[1], [0], [0], [1], [0, 0, 1, 1], [], []>} : vector<8x256xbf16>, vector<256x512xbf16>, vector<8x512xf32> -> vector<8x512xf32>
    %cst_13 = arith.constant 0.000000e+00 : f32
    %16 = vector.broadcast %cst_13 : f32 to vector<8x512xf32>
    %17 = arith.maximumf %15, %16 : vector<8x512xf32>
    %18 = arith.truncf %17 : vector<8x512xf32> to vector<8x512xbf16>
    %c0_14 = arith.constant 0 : index
    %c0_15 = arith.constant 0 : index
    %19 = vector.load %arg6[%c0_14, %c0_15] : memref<512x128xbf16, #tpu.memory_space<vmem>>, vector<512x128xbf16>
    %cst_16 = arith.constant dense<0.000000e+00> : vector<8x128xf32>
    %20 = tpu.matmul %18, %19, %cst_16 {dimension_numbers = #tpu.dot_dimension_numbers<[1], [0], [0], [1], [0, 0, 1, 1], [], []>} : vector<8x512xbf16>, vector<512x128xbf16>, vector<8x128xf32> -> vector<8x128xf32>
    %c0_17 = arith.constant 0 : index
    %c0_18 = arith.constant 0 : index
    %21 = vector.load %arg7[%c0_17, %c0_18] : memref<1x128xf32, #tpu.memory_space<vmem>>, vector<1x128xf32>
    %22 = vector.broadcast %21 : vector<1x128xf32> to vector<8x128xf32>
    %23 = arith.addf %20, %22 : vector<8x128xf32>
    %c0_19 = arith.constant 0 : index
    %c0_20 = arith.constant 0 : index
    %24 = vector.load %arg8[%c0_19, %c0_20] : memref<8x128xf32, #tpu.memory_space<vmem>>, vector<8x128xf32>
    tpu.vector_store %arg8[%c0_19, %c0_20], %23 {strides = array<i32>} : memref<8x128xf32, #tpu.memory_space<vmem>>, vector<8x128xf32>,
    return
  }
  func.func @transform_0(%arg0: i32) -> (i32, i32) {
    %c0_i32 = arith.constant 0 : i32
    %c0_i32_0 = arith.constant 0 : i32
    return %arg0, %c0_i32 : i32, i32
  }
  func.func @transform_1(%arg0: i32) -> (i32, i32) {
    %c0_i32 = arith.constant 0 : i32
    %c0_i32_0 = arith.constant 0 : i32
    %c0_i32_1 = arith.constant 0 : i32
    return %c0_i32, %c0_i32_0 : i32, i32
  }
  func.func @transform_2(%arg0: i32) -> (i32, i32) {
    %c0_i32 = arith.constant 0 : i32
    %c0_i32_0 = arith.constant 0 : i32
    %c0_i32_1 = arith.constant 0 : i32
    return %c0_i32, %c0_i32_0 : i32, i32
  }
  func.func @transform_3(%arg0: i32) -> (i32, i32) {
    %c0_i32 = arith.constant 0 : i32
    %c0_i32_0 = arith.constant 0 : i32
    %c0_i32_1 = arith.constant 0 : i32
    return %c0_i32, %c0_i32_0 : i32, i32
  }
  func.func @transform_4(%arg0: i32) -> (i32, i32) {
    %c0_i32 = arith.constant 0 : i32
    %c0_i32_0 = arith.constant 0 : i32
    %c0_i32_1 = arith.constant 0 : i32
    return %c0_i32, %c0_i32_0 : i32, i32
  }
  func.func @transform_5(%arg0: i32) -> (i32, i32) {
    %c0_i32 = arith.constant 0 : i32
    %c0_i32_0 = arith.constant 0 : i32
    %c0_i32_1 = arith.constant 0 : i32
    return %c0_i32, %c0_i32_0 : i32, i32
  }
  func.func @transform_6(%arg0: i32) -> (i32, i32) {
    %c0_i32 = arith.constant 0 : i32
    %c0_i32_0 = arith.constant 0 : i32
    %c0_i32_1 = arith.constant 0 : i32
    return %c0_i32, %c0_i32_0 : i32, i32
  }
  func.func @transform_7(%arg0: i32) -> (i32, i32) {
    %c0_i32 = arith.constant 0 : i32
    %c0_i32_0 = arith.constant 0 : i32
    return %arg0, %c0_i32 : i32, i32
  }
}

</mosaic_0001>

<bundles_post_ra>
// kernel: tpu_custom_call.1
= control target key start
LH: loop header
LB: loop body
LE: loop exit
PB: predicated region body
PF: predicated region fallthrough
CT: control target
= control target key end

     0   :  { %12 = vsyncpa [#allocation3], 0  ;;  %s2388_s0 = inlined_call_operand.hbm [shape: bf16[8,784], index: 0, kind: input, shape index: {}]   ;;  %s2389_s1 = inlined_call_operand.hbm [shape: bf16[784,128], index: 1, kind: input, shape index: {}]   ;;  %s2390_s2 = inlined_call_operand.vmem [shape: f32[1,128], index: 2, kind: input, shape index: {}]   ;;  %s2391_s3 = inlined_call_operand.hbm [shape: bf16[128,256], index: 3, kind: input, shape index: {}]   ;;  %s2392_s4 = inlined_call_operand.hbm [shape: bf16[256,512], index: 4, kind: input, shape index: {}]   ;;  %s2393_s5 = inlined_call_operand.hbm [shape: bf16[512,128], index: 5, kind: input, shape index: {}]   ;;  %s2394_s6 = inlined_call_operand.vmem [shape: f32[1,128], index: 6, kind: input, shape index: {}]   ;;  %s2395_s7 = inlined_call_operand.hbm [shape: f32[8,128], index: 7, kind: output, shape index: {}]  }
   0x1   :  { %13 = vsyncpa [#allocation6], 0 }
   0x2   :  { %14 = vsyncpa [#allocation9], 0 }
   0x3   :  { %15 = vsyncpa [#allocation4], 0  ;;  %s2303_s24 = smov [#allocation5]  }
   0x4   :  { %s31_s25 = sshll.u32 %s2303_s24, 4  ;;  %s32_s25 = int_to_ptr.vmem [resolvable:$true] %s31_s25 }
   0x5   :  { %s2183_s26 = scalar_lea.vmem %s32_s25, 6272  ;;  %p2188_p1 = scmp.lt.s32.totalorder %s32_s25, %s32_s25 }
   0x6   :  { %p2184_p0 = scmp.ne.s32.totalorder %s32_s25, %s2183_s26  ;;  %p2189_p2 = scmp.lt.s32.totalorder %s2183_s26, %s2183_s26 }
   0x8   :  { %p2190_p3 = por %p2189_p2, %p2188_p1 }
   0xa   :  { %p2191_p4 = pnand %p2190_p3, %p2184_p0 }
   0xc   :  { %2194 = shalt.err (!%p2191_p4)
}
   0xd   :  { %s2304_s27 = smov 64   ;;  %s2305_s28 = smov 4  }
   0xe   :  { %37 = dma.hbm_to_vmem [thread:$0]  %s2389_s1, 6272, %s32_s25, [#allocation6], %s2304_s27, %s2304_s27, %s2305_s28  }
   0xf   :  { %s2306_s8 = smov [#allocation8]  }
  0x10   :  { %s57_s9 = sshll.u32 %s2306_s8, 4  ;;  %s58_s9 = int_to_ptr.vmem [resolvable:$true] %s57_s9 }
  0x11   :  { %s2203_s10 = scalar_lea.vmem %s58_s9, 8192  ;;  %p2208_p6 = scmp.lt.s32.totalorder %s58_s9, %s58_s9 }
  0x12   :  { %p2204_p5 = scmp.ne.s32.totalorder %s58_s9, %s2203_s10  ;;  %p2209_p7 = scmp.lt.s32.totalorder %s2203_s10, %s2203_s10 }
  0x14   :  { %p2210_p8 = por %p2209_p7, %p2208_p6 }
  0x16   :  { %p2211_p9 = pnand %p2210_p8, %p2204_p5 }
  0x18   :  { %2214 = shalt.err (!%p2211_p9)
}
  0x19   :  { %s2307_s11 = smov 256   ;;  %s2308_s12 = smov 16  }
  0x1a   :  { %63 = dma.hbm_to_vmem [thread:$0]  %s2392_s4, 8192, %s58_s9, [#allocation9], %s2307_s11, %s2307_s11, %s2308_s12  }
  0x1b   :  { %s2309_s15 = smov [#allocation2]   ;;  %s2310_s17 = smov [#allocation7]  }
  0x1c   :  { %s22_s16 = sshll.u32 %s2309_s15, 4  ;;  %s45_s1 = sshll.u32 %s2310_s17, 4  ;;  %s23_s16 = int_to_ptr.vmem [resolvable:$true] %s22_s16  ;;  %s46_s1 = int_to_ptr.vmem [resolvable:$true] %s45_s1 }
  0x1d   :  { %s2223_s18 = scalar_lea.vmem %s23_s16, 448  ;;  %p2228_p11 = scmp.lt.s32.totalorder %s23_s16, %s23_s16 }
  0x1e   :  { %p2224_p10 = scmp.ne.s32.totalorder %s23_s16, %s2223_s18  ;;  %p2229_p12 = scmp.lt.s32.totalorder %s2223_s18, %s2223_s18 }
  0x20   :  { %p2230_p13 = por %p2229_p12, %p2228_p11 }
  0x22   :  { %p2231_p0 = pnand %p2230_p13, %p2224_p10 }
  0x24   :  { %2234 = shalt.err (!%p2231_p0)
}
  0x25   :  { %25 = dma.hbm_to_vmem [thread:$0]  %s2388_s0, 448, %s23_s16, [#allocation3]  }
  0x26   :  { %s2243_s21 = scalar_lea.vmem %s46_s1, 2048  ;;  %p2248_p2 = scmp.lt.s32.totalorder %s46_s1, %s46_s1 }
  0x27   :  { %p2244_p1 = scmp.ne.s32.totalorder %s46_s1, %s2243_s21  ;;  %p2249_p3 = scmp.lt.s32.totalorder %s2243_s21, %s2243_s21 }
  0x29   :  { %p2250_p4 = por %p2249_p3, %p2248_p2 }
  0x2b   :  { %p2251_p5 = pnand %p2250_p4, %p2244_p1 }
  0x2d   :  { %2254 = shalt.err (!%p2251_p5)
}
  0x2e   :  { %s2311_s4 = smov 128   ;;  %s2312_s22 = smov 8  }
  0x2f   :  { %51 = dma.hbm_to_vmem [thread:$0]  %s2391_s3, 2048, %s46_s1, [#allocation6], %s2311_s4, %s2311_s4, %s2312_s22  }
  0x30   :  { %s2313_s25 = smov [#allocation10]  }
  0x31   :  { %s69_s26 = sshll.u32 %s2313_s25, 4  ;;  %s70_s26 = int_to_ptr.vmem [resolvable:$true] %s69_s26 }
  0x32   :  { %s2263_s29 = scalar_lea.vmem %s70_s26, 4096  ;;  %p2268_p7 = scmp.lt.s32.totalorder %s70_s26, %s70_s26 }
  0x33   :  { %p2264_p6 = scmp.ne.s32.totalorder %s70_s26, %s2263_s29  ;;  %p2269_p8 = scmp.lt.s32.totalorder %s2263_s29, %s2263_s29 }
  0x35   :  { %p2270_p9 = por %p2269_p8, %p2268_p7 }
  0x37   :  { %p2271_p10 = pnand %p2270_p9, %p2264_p6 }
  0x39   :  { %2274 = shalt.err (!%p2271_p10)
}
  0x3a   :  { %75 = dma.hbm_to_vmem [thread:$0]  %s2393_s5, 4096, %s70_s26, [#allocation9], %s2304_s27, %s2304_s27, %s2305_s28  }
  0x3b   :  { %2295 = dma.done.wait [#allocation3], 448  }
  0x3c   :  { %2296 = vsyncadd [#allocation3], 4294966848 }
  0x3d   :  { %2297 = dma.done.wait [#allocation6], 8320  }
  0x3e   :  { %2298 = vsyncadd [#allocation6], 4294958976 }
  0x3f   :  { %2299 = dma.done.wait [#allocation9], 12288  }
  0x40   :  { %2300 = vsyncadd [#allocation9], 4294955008  ;;  %v1967_v0 = vld [vmem:[#allocation5 + $0x78] sm:$0xff]   ;;  %v1971_v4 = vld [vmem:[#allocation5 + $0x70] sm:$0xff]   ;;  %v2314_v43 = vmov 0.0   ;;  %vm2315_vm0 = vmmov 0  }
  0x41   :  { %v1968_v1 = vld [vmem:[#allocation5 + $0x38] sm:$0xff]   ;;  %1834 = vmatprep.subr.bf16.mxu0 %v1967_v0  ;;  %v1972_v5 = vld [vmem:[#allocation5 + $0x30] sm:$0xff]   ;;  %v1975_v8 = vld [vmem:[#allocation5 + $0x68] sm:$0xff]   ;;  %vm521_vm1 = vcmask 130048   ;;  %s2317_s28 = smov [#allocation11]  }
  0x42   :  { %v1969_v2 = vld [vmem:[#allocation5 + $0xf8] sm:$0xff]   ;;  %1835 = vmatpush3.bf16.msra.mxu0 %v1968_v1  ;;  %v1973_v6 = vld [vmem:[#allocation5 + $0xf0] sm:$0xff]   ;;  %v1976_v9 = vld [vmem:[#allocation5 + $0x28] sm:$0xff]   ;;  %s1652_s8 = sshll.u32 %s2317_s28, 4  ;;  %s1653_s8 = int_to_ptr.vmem [resolvable:$true] %s1652_s8 }
  0x43   :  { %v1970_v3 = vld [vmem:[#allocation5 + $0xb8] sm:$0xff]   ;;  %1856 = vmatprep.subr.bf16.mxu1 %v1969_v2  ;;  %1836 = vmatprep.subr.bf16.mxu0 %v1971_v4  ;;  %v1974_v7 = vld [vmem:[#allocation5 + $0xb0] sm:$0xff]   ;;  %v1977_v10 = vld [vmem:[#allocation5 + $0xe8] sm:$0xff]   ;;  %s2275_s9 = scalar_lea.vmem %s1653_s8, 128  ;;  %p2280_p12 = scmp.lt.s32.totalorder %s1653_s8, %s1653_s8 }
  0x44   :  { %1857 = vmatpush3.bf16.msra.mxu1 %v1970_v3  ;;  %v1978_v11 = vld [vmem:[#allocation5 + $0xa8] sm:$0xff]   ;;  %v1979_v12 = vld [vmem:[#allocation5 + $0x60] sm:$0xff]   ;;  %v1983_v16 = vld [vmem:[#allocation5 + $0x58] sm:$0xff]   ;;  %p2276_p11 = scmp.ne.s32.totalorder %s1653_s8, %s2275_s9  ;;  %p2281_p13 = scmp.lt.s32.totalorder %s2275_s9, %s2275_s9 }
  0x45   :  { %1858 = vmatprep.subr.bf16.mxu1 %v1973_v6  ;;  %v1980_v13 = vld [vmem:[#allocation5 + $0x20] sm:$0xff]   ;;  %v1984_v17 = vld [vmem:[#allocation5 + $0x18] sm:$0xff]   ;;  %v1987_v20 = vld [vmem:[#allocation5 + $0x50] sm:$0xff]  }
  0x46   :  { %1837 = vmatpush3.bf16.msra.mxu0 %v1972_v5  ;;  %v1981_v14 = vld [vmem:[#allocation5 + $0xe0] sm:$0xff]   ;;  %v1985_v18 = vld [vmem:[#allocation5 + $0xd8] sm:$0xff]   ;;  %v1988_v21 = vld [vmem:[#allocation5 + $0x10] sm:$0xff]   ;;  %p2282_p0 = por %p2281_p13, %p2280_p12 }
  0x47   :  { %1838 = vmatprep.subr.bf16.mxu0 %v1975_v8  ;;  %v1982_v15 = vld [vmem:[#allocation5 + $0xa0] sm:$0xff]   ;;  %v1986_v19 = vld [vmem:[#allocation5 + $0x98] sm:$0xff]   ;;  %v1989_v22 = vld [vmem:[#allocation5 + $0xd0] sm:$0xff]  }
  0x48   :  { %1859 = vmatpush3.bf16.msra.mxu1 %v1974_v7  ;;  %v1990_v23 = vld [vmem:[#allocation5 + $0x90] sm:$0xff]   ;;  %v1991_v24 = vld [vmem:[#allocation5 + $0x48] sm:$0xff]   ;;  %v1995_v28 = vld [vmem:[#allocation5 + $0x40] sm:$0xff]   ;;  %p2283_p1 = pnand %p2282_p0, %p2276_p11 }
  0x49   :  { %1860 = vmatprep.subr.bf16.mxu1 %v1977_v10  ;;  %v1992_v25 = vld [vmem:[#allocation5 + $0x8] sm:$0xff]   ;;  %v1996_v29 = vld [vmem:[#allocation5] sm:$0xff]   ;;  %v2001_v35 = vld [vmem:[#allocation5 + $0x178] sm:$0xff]  }
  0x4a   :  { %1839 = vmatpush3.bf16.msra.mxu0 %v1976_v9  ;;  %v1993_v26 = vld [vmem:[#allocation5 + $0xc8] sm:$0xff]   ;;  %v1997_v30 = vld [vmem:[#allocation5 + $0xc0] sm:$0xff]   ;;  %v2004_v39 = vld [vmem:[#allocation5 + $0x138] sm:$0xff]  }
  0x4b   :  { %1840 = vmatprep.subr.bf16.mxu0 %v1979_v12  ;;  %v1994_v27 = vld [vmem:[#allocation5 + $0x88] sm:$0xff]   ;;  %v2000_v34 = vld [vmem:[#allocation5 + $0x80] sm:$0xff]   ;;  %v2005_v40 = vld [vmem:[#allocation5 + $0x170] sm:$0xff]   ;;  %v2316_v12 = vmov 0  }
  0x4c   :  { %1861 = vmatpush3.bf16.msra.mxu1 %v1978_v11  ;;  %v94_v31 = vld [vmem:[#allocation2] sm:$0xff]  ;;  %v95_v36 = vld [vmem:[#allocation2 + $0x8] sm:$0xff]  ;;  %v2011_v47 = vld [vmem:[#allocation5 + $0x158] sm:$0xff]  }
  0x4d   :  { %1862 = vmatprep.subr.bf16.mxu1 %v1981_v14  ;;  %v1664_v32 = vcombine.low %v94_v31, %v94_v31  ;;  %v1665_v33 = vcombine.high %v94_v31, %v94_v31  ;;  %v1666_v37 = vcombine.low %v95_v36, %v95_v36  ;;  %v1667_v38 = vcombine.high %v95_v36, %v95_v36  ;;  %v2006_v41 = vld [vmem:[#allocation5 + $0x130] sm:$0xff]   ;;  %v2007_v42 = vld [vmem:[#allocation5 + $0x168] sm:$0xff]   ;;  %v2009_v45 = vld [vmem:[#allocation5 + $0x160] sm:$0xff]  }
  0x4e   :  { %1841 = vmatpush3.bf16.msra.mxu0 %v1980_v13  ;;  %v2008_v44 = vld [vmem:[#allocation5 + $0x128] sm:$0xff]   ;;  %v2010_v46 = vld [vmem:[#allocation5 + $0x120] sm:$0xff]   ;;  %v2012_v48 = vld [vmem:[#allocation5 + $0x118] sm:$0xff]  }
  0x4f   :  { %1842 = vmatprep.subr.bf16.mxu0 %v1983_v16  ;;  %557 = vmatprep.mubr.bf16.mxu0 %v1665_v33  ;;  %v2013_v49 = vld [vmem:[#allocation5 + $0x150] sm:$0xff]   ;;  %v2019_v50 = vld [vmem:[#allocation5 + $0x180] sm:$0xff]   ;;  %v2022_v54 = vld [vmem:[#allocation2 + $0x18] ss:$0 sps:$4 sm:$0xff]  }
  0x50   :  { %1863 = vmatpush3.bf16.msra.mxu1 %v1982_v15  ;;  %597 = vmatprep.mubr.bf16.mxu1 %v1667_v38  ;;  %v96_v51 = vld [vmem:[#allocation2 + $0x10] sm:$0xff]  ;;  %v2015_v55 = vld [vmem:[#allocation5 + $0x148] sm:$0xff]   ;;  %v2017_v57 = vld [vmem:[#allocation5 + $0x140] sm:$0xff]  }
  0x51   :  { %1864 = vmatprep.subr.bf16.mxu1 %v1985_v18  ;;  %v2014_v52 = vld [vmem:[#allocation5 + $0x110] sm:$0xff]   ;;  %v1669_v53 = vcombine.high %v96_v51, %v96_v51  ;;  %v2016_v56 = vld [vmem:[#allocation5 + $0x108] sm:$0xff]   ;;  %v2018_v58 = vld [vmem:[#allocation5 + $0x100] sm:$0xff]   ;;  %v1668_v59 = vcombine.low %v96_v51, %v96_v51 }
  0x52   :  { %1843 = vmatpush3.bf16.msra.mxu0 %v1984_v17  ;;  %v2023_v60 = vld [vmem:[#allocation7 + $0x70] ss:$8 sps:$4 sm:$0xff]   ;;  %v2025_v61 = vld [vmem:[#allocation7 + $0x74] ss:$8 sps:$4 sm:$0xff]   ;;  %v2028_v62 = vld [vmem:[#allocation7 + $0x64] ss:$8 sps:$4 sm:$0xff]  }
  0x53   :  { %1844 = vmatprep.subr.bf16.mxu0 %v1987_v20  ;;  %v2026_v63 = vld [vmem:[#allocation7 + $0x60] ss:$8 sps:$4 sm:$0xff]   ;;  %v2031_v0 = vld [vmem:[#allocation7 + $0x54] ss:$8 sps:$4 sm:$0xff]   ;;  %v2029_v1 = vld [vmem:[#allocation7 + $0x50] ss:$8 sps:$4 sm:$0xff]  }
  0x54   :  { %1865 = vmatpush3.bf16.msra.mxu1 %v1986_v19  ;;  %v2034_v2 = vld [vmem:[#allocation7 + $0x44] ss:$8 sps:$4 sm:$0xff]   ;;  %v2032_v3 = vld [vmem:[#allocation7 + $0x40] ss:$8 sps:$4 sm:$0xff]   ;;  %v2037_v4 = vld [vmem:[#allocation7 + $0x34] ss:$8 sps:$4 sm:$0xff]  }
  0x55   :  { %1866 = vmatprep.subr.bf16.mxu1 %v1989_v22  ;;  %v2035_v5 = vld [vmem:[#allocation7 + $0x30] ss:$8 sps:$4 sm:$0xff]   ;;  %v2040_v6 = vld [vmem:[#allocation7 + $0x24] ss:$8 sps:$4 sm:$0xff]   ;;  %v2038_v7 = vld [vmem:[#allocation7 + $0x20] ss:$8 sps:$4 sm:$0xff]  }
  0x56   :  { %1845 = vmatpush3.bf16.msra.mxu0 %v1988_v21  ;;  %v2043_v8 = vld [vmem:[#allocation7 + $0x14] ss:$8 sps:$4 sm:$0xff]   ;;  %v2041_v9 = vld [vmem:[#allocation7 + $0x10] ss:$8 sps:$4 sm:$0xff]   ;;  %v2046_v10 = vld [vmem:[#allocation7 + $0x4] ss:$8 sps:$4 sm:$0xff]  }
  0x57   :  { %1846 = vmatprep.subr.bf16.mxu0 %v1991_v24  ;;  %v2044_v11 = vld [vmem:[#allocation7] ss:$8 sps:$4 sm:$0xff]   ;;  %v2049_v14 = vld [vmem:[#allocation8 + $0xe4] ss:$16 sps:$4 sm:$0xff]   ;;  %v2052_v15 = vld [vmem:[#allocation8 + $0xec] ss:$16 sps:$4 sm:$0xff]  }
  0x58   :  { %1867 = vmatpush3.bf16.msra.mxu1 %v1990_v23  ;;  %v2047_v13 = vld [vmem:[#allocation8 + $0xe0] ss:$16 sps:$4 sm:$0xff]   ;;  %v2055_v16 = vld [vmem:[#allocation8 + $0xc4] ss:$16 sps:$4 sm:$0xff]  }
  0x59   :  { %1868 = vmatprep.subr.bf16.mxu1 %v1993_v26  ;;  %v2053_v17 = vld [vmem:[#allocation8 + $0xc0] ss:$16 sps:$4 sm:$0xff]   ;;  %v2061_v18 = vld [vmem:[#allocation8 + $0xa4] ss:$16 sps:$4 sm:$0xff]  }
  0x5a   :  { %1847 = vmatpush3.bf16.msra.mxu0 %v1992_v25  ;;  %v2059_v19 = vld [vmem:[#allocation8 + $0xa0] ss:$16 sps:$4 sm:$0xff]   ;;  %v2067_v20 = vld [vmem:[#allocation8 + $0x84] ss:$16 sps:$4 sm:$0xff]  }
  0x5b   :  { %1848 = vmatprep.subr.bf16.mxu0 %v1995_v28  ;;  %v2065_v21 = vld [vmem:[#allocation8 + $0x80] ss:$16 sps:$4 sm:$0xff]   ;;  %v2073_v22 = vld [vmem:[#allocation8 + $0x64] ss:$16 sps:$4 sm:$0xff]  }
  0x5c   :  { %1869 = vmatpush3.bf16.msra.mxu1 %v1994_v27  ;;  %v2071_v23 = vld [vmem:[#allocation8 + $0x60] ss:$16 sps:$4 sm:$0xff]   ;;  %v2079_v24 = vld [vmem:[#allocation8 + $0x44] ss:$16 sps:$4 sm:$0xff]  }
  0x5d   :  { %1870 = vmatprep.subr.bf16.mxu1 %v1997_v30  ;;  %v2077_v25 = vld [vmem:[#allocation8 + $0x40] ss:$16 sps:$4 sm:$0xff]   ;;  %v2085_v26 = vld [vmem:[#allocation8 + $0x24] ss:$16 sps:$4 sm:$0xff]  }
  0x5e   :  { %1849 = vmatpush3.bf16.msra.mxu0 %v1996_v29  ;;  %v2083_v27 = vld [vmem:[#allocation8 + $0x20] ss:$16 sps:$4 sm:$0xff]   ;;  %v2091_v28 = vld [vmem:[#allocation8 + $0x4] ss:$16 sps:$4 sm:$0xff]  }
  0x5f   :  { %1878 = vmatprep.subr.bf16.mxu0 %v2001_v35  ;;  %v2089_v29 = vld [vmem:[#allocation8] ss:$16 sps:$4 sm:$0xff]   ;;  %v2097_v30 = vld [vmem:[#allocation8 + $0x1e4] ss:$16 sps:$4 sm:$0xff]  }
  0x60   :  { %1871 = vmatpush3.bf16.msra.mxu1 %v2000_v34  ;;  %v2095_v31 = vld [vmem:[#allocation8 + $0x1e0] ss:$16 sps:$4 sm:$0xff]   ;;  %v2109_v34 = vld [vmem:[#allocation8 + $0x1a4] ss:$16 sps:$4 sm:$0xff]  }
  0x61   :  { %558 = vmatmul.mubr.bf16.vlgmr.msra.gmra.mxu0 %v1664_v32  ;;  %1946 = vmatprep.subr.bf16.mxu1 %v2314_v43  ;;  %v2103_v32 = vld [vmem:[#allocation8 + $0x1c4] ss:$16 sps:$4 sm:$0xff]   ;;  %v2101_v33 = vld [vmem:[#allocation8 + $0x1c0] ss:$16 sps:$4 sm:$0xff]  }
  0x62   :  { %1879 = vmatpush3.bf16.msra.mxu0 %v2004_v39  ;;  %637 = vmatprep.mubr.bf16.mxu0 %v1669_v53  ;;  %v2107_v35 = vld [vmem:[#allocation8 + $0x1a0] ss:$16 sps:$4 sm:$0xff]   ;;  %v2115_v36 = vld [vmem:[#allocation8 + $0x184] ss:$16 sps:$4 sm:$0xff]  }
  0x63   :  { %598 = vmatmul.mubr.bf16.vlgmr.msra.gmra.mxu1 %v1666_v37  ;;  %1880 = vmatprep.subr.bf16.mxu0 %v2005_v40  ;;  %v2113_v37 = vld [vmem:[#allocation8 + $0x180] ss:$16 sps:$4 sm:$0xff]   ;;  %v2121_v38 = vld [vmem:[#allocation8 + $0x164] ss:$16 sps:$4 sm:$0xff]  }
  0x64   :  { %1948 = vmatprep.mubr.msk.bf16.mxu1 %vm2315_vm0, %v2314_v43  ;;  %1947 = vmatpush3.bf16.msra.mxu1 %v2019_v50  ;;  %v2119_v39 = vld [vmem:[#allocation8 + $0x160] ss:$16 sps:$4 sm:$0xff]   ;;  %v2127_v40 = vld [vmem:[#allocation8 + $0x144] ss:$16 sps:$4 sm:$0xff]  }
  0x65   :  { %783 = vmatprep.subr.bf16.mxu1 %v2025_v61 }
  0x66   :  { %1881 = vmatpush3.bf16.msra.mxu0 %v2006_v41  ;;  %v2125_v41 = vld [vmem:[#allocation8 + $0x140] ss:$16 sps:$4 sm:$0xff]  }
  0x67   :  { %1882 = vmatprep.subr.bf16.mxu0 %v2007_v42 }
  0x6a   :  { %1883 = vmatpush3.bf16.msra.mxu0 %v2008_v44 }
  0x6b   :  { %1884 = vmatprep.subr.bf16.mxu0 %v2009_v45  ;;  %1949 = vmatmul.mubr.msk.bf16.vlgmr.msra.gmra.mxu1 %vm521_vm1, %v2022_v54 }
  0x6c   :  { %784 = vmatpush1.bf16.msra.mxu1 %v2023_v60  ;;  %815 = vmatprep.mubr.bf16.mxu1 %v2316_v12  ;;  %v2074_v12 = vld [vmem:[#allocation8 + $0x68] ss:$16 sps:$4 sm:$0xff]  }
  0x6d   :  { %785 = vmatprep.subr.bf16.mxu1 %v2028_v62 }
  0x6e   :  { %1885 = vmatpush3.bf16.msra.mxu0 %v2010_v46 }
  0x6f   :  { %1886 = vmatprep.subr.bf16.mxu0 %v2011_v47 }
  0x70   :  { %786 = vmatpush1.bf16.msra.mxu1 %v2026_v63 }
  0x71   :  { %787 = vmatprep.subr.bf16.mxu1 %v2031_v0 }
  0x72   :  { %1887 = vmatpush3.bf16.msra.mxu0 %v2012_v48 }
  0x73   :  { %1888 = vmatprep.subr.bf16.mxu0 %v2013_v49 }
  0x74   :  { %788 = vmatpush1.bf16.msra.mxu1 %v2029_v1 }
  0x75   :  { %789 = vmatprep.subr.bf16.mxu1 %v2034_v2 }
  0x76   :  { %1889 = vmatpush3.bf16.msra.mxu0 %v2014_v52 }
  0x77   :  { %1890 = vmatprep.subr.bf16.mxu0 %v2015_v55  ;;  %v1663_v55 = vld [vmem:[%s2390_s2] ss:$0 sm:$0xff] }
  0x78   :  { %790 = vmatpush1.bf16.msra.mxu1 %v2032_v3  ;;  %v2050_v3 = vld [vmem:[#allocation8 + $0xe8] ss:$16 sps:$4 sm:$0xff]  }
  0x79   :  { %791 = vmatprep.subr.bf16.mxu1 %v2037_v4 }
  0x7a   :  { %1891 = vmatpush3.bf16.msra.mxu0 %v2016_v56 }
  0x7b   :  { %1892 = vmatprep.subr.bf16.mxu0 %v2017_v57 }
  0x7c   :  { %792 = vmatpush1.bf16.msra.mxu1 %v2035_v5  ;;  %v2058_v5 = vld [vmem:[#allocation8 + $0xcc] ss:$16 sps:$4 sm:$0xff]  }
  0x7d   :  { %793 = vmatprep.subr.bf16.mxu1 %v2040_v6  ;;  %v2056_v6 = vld [vmem:[#allocation8 + $0xc8] ss:$16 sps:$4 sm:$0xff]  }
  0x7e   :  { %1893 = vmatpush3.bf16.msra.mxu0 %v2018_v58 }
  0x7f   :  { %1212 = vmatprep.subr.bf16.mxu0 %v2049_v14  ;;  %v2080_v14 = vld [vmem:[#allocation8 + $0x48] ss:$16 sps:$4 sm:$0xff]  }
  0x80   :  { %794 = vmatpush1.bf16.msra.mxu1 %v2038_v7  ;;  %v2064_v7 = vld [vmem:[#allocation8 + $0xac] ss:$16 sps:$4 sm:$0xff]  }
  0x81   :  { %638 = vmatmul.mubr.bf16.vlgmr.msra.gmra.mxu0 %v1668_v59  ;;  %795 = vmatprep.subr.bf16.mxu1 %v2043_v8  ;;  %v2062_v8 = vld [vmem:[#allocation8 + $0xa8] ss:$16 sps:$4 sm:$0xff]  }
  0x82   :  { %1213 = vmatpush1.bf16.msra.mxu0 %v2047_v13  ;;  %v2082_v13 = vld [vmem:[#allocation8 + $0x4c] ss:$16 sps:$4 sm:$0xff]  }
  0x83   :  { %1214 = vmatprep.subr.bf16.mxu0 %v2055_v16  ;;  %v2086_v16 = vld [vmem:[#allocation8 + $0x28] ss:$16 sps:$4 sm:$0xff]  }
  0x84   :  { %796 = vmatpush1.bf16.msra.mxu1 %v2041_v9  ;;  %v2070_v9 = vld [vmem:[#allocation8 + $0x8c] ss:$16 sps:$4 sm:$0xff]  }
  0x85   :  { %797 = vmatprep.subr.bf16.mxu1 %v2046_v10  ;;  %v2068_v10 = vld [vmem:[#allocation8 + $0x88] ss:$16 sps:$4 sm:$0xff]  }
  0x86   :  { %1215 = vmatpush1.bf16.msra.mxu0 %v2053_v17  ;;  %v2094_v17 = vld [vmem:[#allocation8 + $0xc] ss:$16 sps:$4 sm:$0xff]  }
  0x87   :  { %1216 = vmatprep.subr.bf16.mxu0 %v2061_v18  ;;  %v2092_v18 = vld [vmem:[#allocation8 + $0x8] ss:$16 sps:$4 sm:$0xff]  }
  0x88   :  { %798 = vmatpush1.bf16.msra.mxu1 %v2044_v11  ;;  %v2076_v11 = vld [vmem:[#allocation8 + $0x6c] ss:$16 sps:$4 sm:$0xff]  }
  0x89   :  { %1253 = vmatprep.subr.bf16.mxu1 %v2052_v15  ;;  %v2088_v15 = vld [vmem:[#allocation8 + $0x2c] ss:$16 sps:$4 sm:$0xff]  }
  0x8a   :  { %1217 = vmatpush1.bf16.msra.mxu0 %v2059_v19  ;;  %v2100_v19 = vld [vmem:[#allocation8 + $0x1ec] ss:$16 sps:$4 sm:$0xff]  }
  0x8b   :  { %1218 = vmatprep.subr.bf16.mxu0 %v2067_v20  ;;  %v2098_v20 = vld [vmem:[#allocation8 + $0x1e8] ss:$16 sps:$4 sm:$0xff]  }
  0x8e   :  { %1219 = vmatpush1.bf16.msra.mxu0 %v2065_v21  ;;  %v2106_v21 = vld [vmem:[#allocation8 + $0x1cc] ss:$16 sps:$4 sm:$0xff]  }
  0x8f   :  { %1220 = vmatprep.subr.bf16.mxu0 %v2073_v22  ;;  %v2104_v22 = vld [vmem:[#allocation8 + $0x1c8] ss:$16 sps:$4 sm:$0xff]  }
  0x92   :  { %1221 = vmatpush1.bf16.msra.mxu0 %v2071_v23  ;;  %v2112_v23 = vld [vmem:[#allocation8 + $0x1ac] ss:$16 sps:$4 sm:$0xff]  }
  0x93   :  { %1222 = vmatprep.subr.bf16.mxu0 %v2079_v24  ;;  %v2110_v24 = vld [vmem:[#allocation8 + $0x1a8] ss:$16 sps:$4 sm:$0xff]  }
  0x96   :  { %1223 = vmatpush1.bf16.msra.mxu0 %v2077_v25  ;;  %v2118_v25 = vld [vmem:[#allocation8 + $0x18c] ss:$16 sps:$4 sm:$0xff]  }
  0x97   :  { %1224 = vmatprep.subr.bf16.mxu0 %v2085_v26  ;;  %v2116_v26 = vld [vmem:[#allocation8 + $0x188] ss:$16 sps:$4 sm:$0xff]  }
  0x9a   :  { %1225 = vmatpush1.bf16.msra.mxu0 %v2083_v27  ;;  %v2124_v27 = vld [vmem:[#allocation8 + $0x16c] ss:$16 sps:$4 sm:$0xff]  }
  0x9b   :  { %1226 = vmatprep.subr.bf16.mxu0 %v2091_v28  ;;  %v2122_v28 = vld [vmem:[#allocation8 + $0x168] ss:$16 sps:$4 sm:$0xff]  }
  0x9e   :  { %1227 = vmatpush1.bf16.msra.mxu0 %v2089_v29  ;;  %v2130_v29 = vld [vmem:[#allocation8 + $0x14c] ss:$16 sps:$4 sm:$0xff]  }
  0x9f   :  { %1228 = vmatprep.subr.bf16.mxu0 %v2097_v30  ;;  %v2128_v30 = vld [vmem:[#allocation8 + $0x148] ss:$16 sps:$4 sm:$0xff]  }
  0xa2   :  { %1229 = vmatpush2.bf16.msra.mxu0 %v2095_v31  ;;  %v2133_v31 = vld [vmem:[#allocation8 + $0x124] ss:$16 sps:$4 sm:$0xff]  }
  0xa3   :  { %1230 = vmatprep.subr.bf16.mxu0 %v2103_v32  ;;  %v2136_v32 = vld [vmem:[#allocation8 + $0x12c] ss:$16 sps:$4 sm:$0xff]  }
  0xa6   :  { %1231 = vmatpush2.bf16.msra.mxu0 %v2101_v33  ;;  %v2131_v33 = vld [vmem:[#allocation8 + $0x120] ss:$16 sps:$4 sm:$0xff]  }
  0xa7   :  { %1232 = vmatprep.subr.bf16.mxu0 %v2109_v34  ;;  %v2134_v34 = vld [vmem:[#allocation8 + $0x128] ss:$16 sps:$4 sm:$0xff]  }
  0xaa   :  { %1233 = vmatpush2.bf16.msra.mxu0 %v2107_v35  ;;  %v2139_v35 = vld [vmem:[#allocation8 + $0x104] ss:$16 sps:$4 sm:$0xff]  }
  0xab   :  { %1234 = vmatprep.subr.bf16.mxu0 %v2115_v36  ;;  %v2142_v36 = vld [vmem:[#allocation8 + $0x10c] ss:$16 sps:$4 sm:$0xff]  }
  0xae   :  { %1235 = vmatpush2.bf16.msra.mxu0 %v2113_v37  ;;  %v2137_v37 = vld [vmem:[#allocation8 + $0x100] ss:$16 sps:$4 sm:$0xff]  }
  0xaf   :  { %1236 = vmatprep.subr.bf16.mxu0 %v2121_v38  ;;  %v2140_v38 = vld [vmem:[#allocation8 + $0x108] ss:$16 sps:$4 sm:$0xff]  }
  0xb2   :  { %1237 = vmatpush2.bf16.msra.mxu0 %v2119_v39  ;;  %v2143_v39 = vld [vmem:[#allocation10 + $0x78] sm:$0xff]  }
  0xb3   :  { %1238 = vmatprep.subr.bf16.mxu0 %v2127_v40  ;;  %v2144_v40 = vld [vmem:[#allocation10 + $0xf8] sm:$0xff]  }
  0xb6   :  { %1239 = vmatpush2.bf16.msra.mxu0 %v2125_v41 }
  0xb7   :  { %1240 = vmatprep.subr.bf16.mxu0 %v2133_v31 }
  0xba   :  { %1241 = vmatpush2.bf16.msra.mxu0 %v2131_v33  ;;  %v1801_v33 = vld [vmem:[%s2394_s6] ss:$0 sm:$0xff] }
  0xbb   :  { %1242 = vmatprep.subr.bf16.mxu0 %v2139_v35 }
  0xbe   :  { %1243 = vmatpush2.bf16.msra.mxu0 %v2137_v37 }
  0xbf   :  { %1902 = vmatprep.subr.bf16.mxu0 %v2143_v39 }
 0x121   :  { %v1850_v42 = vpop.f32.mrf.mxu0 }
 0x123   :  { %v1851_v43 = vpop.f32.mrf.mxu0  ;;  %v1872_v44 = vpop.f32.mrf.mxu1 }
 0x124   :  { %v1852_v54 = vadd.f32 %v1851_v43, %v1850_v42 }
 0x125   :  { %v1853_v45 = vpop.f32.mrf.mxu0  ;;  %v1873_v46 = vpop.f32.mrf.mxu1 }
 0x126   :  { %v560_v56 = vadd.f32 %v1852_v54, %v1663_v55  ;;  %v1874_v57 = vadd.f32 %v1873_v46, %v1872_v44  ;;  %v2150_v54 = vld [vmem:[#allocation10 + $0xb0] sm:$0xff]   ;;  %v2151_v55 = vld [vmem:[#allocation10 + $0x68] sm:$0xff]  }
 0x127   :  { %v1854_v47 = vpop.f32.mrf.mxu0  ;;  %v1875_v48 = vpop.f32.mrf.mxu1 }
 0x128   :  { %v600_v60 = vadd.f32 %v1874_v57, %v560_v56  ;;  %v2145_v47 = vld [vmem:[#allocation10 + $0x38] sm:$0xff]   ;;  %v2152_v56 = vld [vmem:[#allocation10 + $0xe8] sm:$0xff]  }
 0x129   :  { %v1876_v49 = vpop.f32.mrf.mxu1  ;;  %v2146_v48 = vld [vmem:[#allocation10 + $0xb8] sm:$0xff]   ;;  %v2153_v57 = vld [vmem:[#allocation10 + $0x28] sm:$0xff]  }
 0x12b   :  { %v679_v50 = vpop.f32.mrf.mxu1 }
 0x12d   :  { %v1950_v51 = vpop.f32.mrf.mxu1 }
 0x12e   :  { %v2147_v51 = vld [vmem:[#allocation10 + $0x70] sm:$0xff]  }
 0x12f   :  { %v682_v52 = vpop.f32.mrf.mxu1 }
 0x130   :  { %v2148_v52 = vld [vmem:[#allocation10 + $0xf0] sm:$0xff]  }
 0x131   :  { %v1951_v53 = vpop.f32.mrf.mxu1 }
 0x132   :  { %v2149_v53 = vld [vmem:[#allocation10 + $0x30] sm:$0xff]  }
 0x141   :  { %v1894_v58 = vpop.f32.mrf.mxu0 }
 0x143   :  { %v1895_v59 = vpop.f32.mrf.mxu0 }
 0x144   :  { %v1896_v61 = vadd.f32 %v1895_v59, %v1894_v58  ;;  %v2154_v58 = vld [vmem:[#allocation10 + $0xa8] sm:$0xff]   ;;  %v2155_v59 = vld [vmem:[#allocation10 + $0x60] sm:$0xff]  }
 0x145   :  { %v1897_v62 = vpop.f32.mrf.mxu0 }
 0x146   :  { %v640_v63 = vadd.f32 %v1896_v61, %v600_v60  ;;  %v2156_v60 = vld [vmem:[#allocation10 + $0xe0] sm:$0xff]  }
 0x147   :  { %v1898_v0 = vpop.f32.mrf.mxu0  ;;  %v2157_v61 = vld [vmem:[#allocation10 + $0x20] sm:$0xff]  }
 0x148   :  { %v680_v1 = vadd.f32 %v679_v50, %v640_v63  ;;  %v2158_v62 = vld [vmem:[#allocation10 + $0xa0] sm:$0xff]   ;;  %v2159_v63 = vld [vmem:[#allocation10 + $0x58] sm:$0xff]  }
 0x149   :  { %v2160_v0 = vld [vmem:[#allocation10 + $0xd8] sm:$0xff]  }
 0x14a   :  { %v685_v2 = vmax.f32 %v680_v1, 0.0  ;;  %v2161_v1 = vld [vmem:[#allocation10 + $0x18] sm:$0xff]  }
 0x14c   :  { %v686_v4 = vpack.c.bf16 %v685_v2, %v685_v2  ;;  %v2162_v2 = vld [vmem:[#allocation10 + $0x98] sm:$0xff]  }
 0x14e   :  { %816 = vmatmul.mubr.bf16.vlgmr.msra.gmra.mxu1 %v686_v4  ;;  %v2164_v4 = vld [vmem:[#allocation10 + $0xd0] sm:$0xff]  }
 0x14f   :  { %1254 = vmatpush1.bf16.msra.mxu1 %v2050_v3  ;;  %v2163_v3 = vld [vmem:[#allocation10 + $0x50] sm:$0xff]  }
 0x150   :  { %1255 = vmatprep.subr.bf16.mxu1 %v2058_v5  ;;  %v2165_v5 = vld [vmem:[#allocation10 + $0x10] sm:$0xff]  }
 0x153   :  { %1256 = vmatpush1.bf16.msra.mxu1 %v2056_v6  ;;  %v2166_v6 = vld [vmem:[#allocation10 + $0x90] sm:$0xff]  }
 0x154   :  { %1257 = vmatprep.subr.bf16.mxu1 %v2064_v7  ;;  %v2167_v7 = vld [vmem:[#allocation10 + $0x48] sm:$0xff]  }
 0x157   :  { %1258 = vmatpush1.bf16.msra.mxu1 %v2062_v8  ;;  %v2168_v8 = vld [vmem:[#allocation10 + $0xc8] sm:$0xff]  }
 0x158   :  { %1259 = vmatprep.subr.bf16.mxu1 %v2070_v9  ;;  %v2169_v9 = vld [vmem:[#allocation10 + $0x8] sm:$0xff]  }
 0x15b   :  { %1260 = vmatpush1.bf16.msra.mxu1 %v2068_v10  ;;  %v2170_v10 = vld [vmem:[#allocation10 + $0x88] sm:$0xff]  }
 0x15c   :  { %1261 = vmatprep.subr.bf16.mxu1 %v2076_v11  ;;  %v2171_v11 = vld [vmem:[#allocation10 + $0x40] sm:$0xff]  }
 0x15f   :  { %1262 = vmatpush1.bf16.msra.mxu1 %v2074_v12  ;;  %v2172_v12 = vld [vmem:[#allocation10 + $0xc0] sm:$0xff]  }
 0x160   :  { %1263 = vmatprep.subr.bf16.mxu1 %v2082_v13  ;;  %v2173_v13 = vld [vmem:[#allocation10] sm:$0xff]  }
 0x163   :  { %1264 = vmatpush1.bf16.msra.mxu1 %v2080_v14  ;;  %v2174_v14 = vld [vmem:[#allocation10 + $0x80] sm:$0xff]  }
 0x164   :  { %1265 = vmatprep.subr.bf16.mxu1 %v2088_v15 }
 0x167   :  { %1266 = vmatpush1.bf16.msra.mxu1 %v2086_v16 }
 0x168   :  { %1267 = vmatprep.subr.bf16.mxu1 %v2094_v17 }
 0x16b   :  { %1268 = vmatpush1.bf16.msra.mxu1 %v2092_v18 }
 0x16c   :  { %1269 = vmatprep.subr.bf16.mxu1 %v2100_v19 }
 0x16f   :  { %1270 = vmatpush2.bf16.msra.mxu1 %v2098_v20 }
 0x170   :  { %1271 = vmatprep.subr.bf16.mxu1 %v2106_v21 }
 0x173   :  { %1272 = vmatpush2.bf16.msra.mxu1 %v2104_v22 }
 0x174   :  { %1273 = vmatprep.subr.bf16.mxu1 %v2112_v23 }
 0x177   :  { %1274 = vmatpush2.bf16.msra.mxu1 %v2110_v24 }
 0x178   :  { %1275 = vmatprep.subr.bf16.mxu1 %v2118_v25 }
 0x17b   :  { %1276 = vmatpush2.bf16.msra.mxu1 %v2116_v26 }
 0x17c   :  { %1277 = vmatprep.subr.bf16.mxu1 %v2124_v27 }
 0x17f   :  { %1278 = vmatpush2.bf16.msra.mxu1 %v2122_v28 }
 0x180   :  { %1279 = vmatprep.subr.bf16.mxu1 %v2130_v29 }
 0x183   :  { %1280 = vmatpush2.bf16.msra.mxu1 %v2128_v30 }
 0x184   :  { %1281 = vmatprep.subr.bf16.mxu1 %v2136_v32 }
 0x187   :  { %1282 = vmatpush2.bf16.msra.mxu1 %v2134_v34 }
 0x188   :  { %1283 = vmatprep.subr.bf16.mxu1 %v2142_v36 }
 0x18b   :  { %1284 = vmatpush2.bf16.msra.mxu1 %v2140_v38 }
 0x18c   :  { %1924 = vmatprep.subr.bf16.mxu1 %v2144_v40 }
 0x20e   :  { %v817_v41 = vpop.f32.mrf.mxu1 }
 0x20f   :  { %v824_v42 = vmax.f32 %v817_v41, 0.0 }
 0x210   :  { %v819_v43 = vpop.f32.mrf.mxu1 }
 0x211   :  { %v825_v44 = vmax.f32 %v819_v43, 0.0  ;;  %v826_v49 = vpack.c.bf16 %v824_v42, %v824_v42 }
 0x212   :  { %v821_v45 = vpop.f32.mrf.mxu1 }
 0x213   :  { %v827_v46 = vpack.c.bf16 %v825_v44, %v825_v44 }
 0x214   :  { %v822_v50 = vpop.f32.mrf.mxu1 }
 0x215   :  { %1244 = vmatprep.mubr.bf16.mxu0 %v827_v46  ;;  %1285 = vmatprep.mubr.bf16.mxu1 %v827_v46 }
 0x216   :  { %1245 = vmatmul.mubr.bf16.vlgmr.msra.gmra.mxu0 %v826_v49  ;;  %1286 = vmatmul.mubr.bf16.vlgmr.msra.gmra.mxu1 %v826_v49 }
 0x217   :  { %1903 = vmatpush3.bf16.msra.mxu0 %v2145_v47  ;;  %1925 = vmatpush3.bf16.msra.mxu1 %v2146_v48 }
 0x218   :  { %1904 = vmatprep.subr.bf16.mxu0 %v2147_v51  ;;  %1926 = vmatprep.subr.bf16.mxu1 %v2148_v52 }
 0x21b   :  { %1905 = vmatpush3.bf16.msra.mxu0 %v2149_v53  ;;  %1927 = vmatpush3.bf16.msra.mxu1 %v2150_v54 }
 0x21c   :  { %1906 = vmatprep.subr.bf16.mxu0 %v2151_v55  ;;  %1928 = vmatprep.subr.bf16.mxu1 %v2152_v56 }
 0x21f   :  { %1907 = vmatpush3.bf16.msra.mxu0 %v2153_v57  ;;  %1929 = vmatpush3.bf16.msra.mxu1 %v2154_v58 }
 0x220   :  { %1908 = vmatprep.subr.bf16.mxu0 %v2155_v59  ;;  %1930 = vmatprep.subr.bf16.mxu1 %v2156_v60 }
 0x223   :  { %1909 = vmatpush3.bf16.msra.mxu0 %v2157_v61  ;;  %1931 = vmatpush3.bf16.msra.mxu1 %v2158_v62 }
 0x224   :  { %1910 = vmatprep.subr.bf16.mxu0 %v2159_v63  ;;  %1932 = vmatprep.subr.bf16.mxu1 %v2160_v0 }
 0x227   :  { %1911 = vmatpush3.bf16.msra.mxu0 %v2161_v1  ;;  %1933 = vmatpush3.bf16.msra.mxu1 %v2162_v2 }
 0x228   :  { %1912 = vmatprep.subr.bf16.mxu0 %v2163_v3  ;;  %1934 = vmatprep.subr.bf16.mxu1 %v2164_v4 }
 0x22b   :  { %1913 = vmatpush3.bf16.msra.mxu0 %v2165_v5  ;;  %1935 = vmatpush3.bf16.msra.mxu1 %v2166_v6 }
 0x22c   :  { %1914 = vmatprep.subr.bf16.mxu0 %v2167_v7  ;;  %1936 = vmatprep.subr.bf16.mxu1 %v2168_v8 }
 0x22f   :  { %1915 = vmatpush3.bf16.msra.mxu0 %v2169_v9  ;;  %1937 = vmatpush3.bf16.msra.mxu1 %v2170_v10 }
 0x230   :  { %1916 = vmatprep.subr.bf16.mxu0 %v2171_v11  ;;  %1938 = vmatprep.subr.bf16.mxu1 %v2172_v12 }
 0x233   :  { %1917 = vmatpush3.bf16.msra.mxu0 %v2173_v13  ;;  %1939 = vmatpush3.bf16.msra.mxu1 %v2174_v14 }
 0x2d6   :  { %v1246_v15 = vpop.f32.mrf.mxu0  ;;  %v1287_v16 = vpop.f32.mrf.mxu1 }
 0x2d7   :  { %v1294_v17 = vmax.f32 %v1246_v15, 0.0  ;;  %v1296_v18 = vmax.f32 %v1287_v16, 0.0 }
 0x2d8   :  { %v1248_v19 = vpop.f32.mrf.mxu0  ;;  %v1289_v20 = vpop.f32.mrf.mxu1 }
 0x2d9   :  { %v1295_v21 = vmax.f32 %v1248_v19, 0.0  ;;  %v1297_v22 = vmax.f32 %v1289_v20, 0.0  ;;  %v1298_v27 = vpack.c.bf16 %v1294_v17, %v1294_v17  ;;  %v1300_v28 = vpack.c.bf16 %v1296_v18, %v1296_v18 }
 0x2da   :  { %v1250_v23 = vpop.f32.mrf.mxu0  ;;  %v1291_v24 = vpop.f32.mrf.mxu1 }
 0x2db   :  { %v1299_v25 = vpack.c.bf16 %v1295_v21, %v1295_v21  ;;  %v1301_v26 = vpack.c.bf16 %v1297_v22, %v1297_v22 }
 0x2dc   :  { %v1251_v29 = vpop.f32.mrf.mxu0  ;;  %v1292_v30 = vpop.f32.mrf.mxu1 }
 0x2dd   :  { %1597 = vmatprep.mubr.bf16.mxu0 %v1299_v25  ;;  %1637 = vmatprep.mubr.bf16.mxu1 %v1301_v26 }
 0x2de   :  { %1598 = vmatmul.mubr.bf16.vlgmr.msra.gmra.mxu0 %v1298_v27  ;;  %1638 = vmatmul.mubr.bf16.vlgmr.msra.gmra.mxu1 %v1300_v28 }
 0x39e   :  { %v1918_v31 = vpop.f32.mrf.mxu0  ;;  %v1940_v32 = vpop.f32.mrf.mxu1 }
 0x3a0   :  { %v1919_v34 = vpop.f32.mrf.mxu0  ;;  %v1941_v35 = vpop.f32.mrf.mxu1 }
 0x3a1   :  { %v1920_v36 = vadd.f32 %v1919_v34, %v1918_v31  ;;  %v1942_v40 = vadd.f32 %v1941_v35, %v1940_v32 }
 0x3a2   :  { %v1921_v37 = vpop.f32.mrf.mxu0  ;;  %v1943_v38 = vpop.f32.mrf.mxu1 }
 0x3a3   :  { %v1600_v39 = vadd.f32 %v1920_v36, %v1801_v33 }
 0x3a4   :  { %v1922_v41 = vpop.f32.mrf.mxu0  ;;  %v1944_v42 = vpop.f32.mrf.mxu1 }
 0x3a5   :  { %v1640_v43 = vadd.f32 %v1942_v40, %v1600_v39 }
 0x3a7   :  { %1645 = vst [vmem:[#allocation11] sm:$0xff] %v1640_v43 }
 0x3a8   :  { %2286 = shalt.err (!%p2283_p1)
}
 0x3a9   :  { %1655 = dma.vmem_to_hbm [thread:$0]  %s1653_s8, 128, %s2395_s7, [#allocation4]  }
 0x3aa   :  { %2301 = dma.done.wait [#allocation4], 128  }
 0x3ab   :  { %2302 = vsyncadd [#allocation4], 4294967168 }
 0x3ac   :  { %1659 = vsyncpa [#allocation3], 1 }
 0x3ad   :  { %1660 = vsyncpa [#allocation6], 1 }
 0x3ae   :  { %1661 = vsyncpa [#allocation9], 1 }
 0x3af   :  { %1662 = vsyncpa [#allocation4], 1 }

</bundles_post_ra>
